<compile_context>
chip_gen: v6e
topology: v6e:2x2x1
jax: 0.10.0
libtpu: 0.0.40
codegen_flags: <defaults>
</compile_context>

<pallas_src>
import jax
import jax.numpy as jnp
from jax.experimental import pallas as pl
from jax.experimental.pallas import tpu as pltpu


def _round_up(n: int, m: int) -> int:
    return ((n + m - 1) // m) * m


def _cdiv(a: int, b: int) -> int:
    return (a + b - 1) // b


def linear_kernel(xt_ref, w_ref, b_ref, o_ref):
    # xt_ref: (2, tb) VMEM tile, batch along lanes (lane-dense).
    # w_ref:  (2,)  SMEM f32 scalars (flattened weight of nn.Linear(2, 1)).
    # b_ref:  (1,)  SMEM f32 scalar (bias).
    # o_ref:  (1, tb) VMEM output tile, lane-dense.
    w0 = w_ref[0]
    w1 = w_ref[1]
    b0 = b_ref[0]
    x0 = xt_ref[0:1, :]                       # (1, tb)
    x1 = xt_ref[1:2, :]                       # (1, tb)
    # Pure VPU FMA: y = w0*x0 + w1*x1 + b   (no MXU push/pop, no XLU transpose)
    o_ref[...] = (x0 * w0 + x1 * w1 + b0).astype(o_ref.dtype)


def _choose_tile(batch: int, tb: int) -> int:
    """Lane-aligned tile, capped so the grid has >= 2 steps (v7x 2-TC sharding)."""
    bp = _round_up(batch, 128)
    tb_eff = _round_up(min(tb, bp), 128)
    if bp >= 256:
        half = _round_up(_cdiv(bp, 2), 128)
        tb_eff = min(tb_eff, half)
    return max(tb_eff, 128)


def linear_forward_feature_major(xt, w, b, *, tb: int = 262144):
    """Pallas path. xt: (2, B) feature-major, w: (1, 2), b: (1,) -> (B, 1)."""
    in_features, batch = xt.shape
    assert in_features == 2 and w.shape[0] == 1 and w.shape[1] == 2 and b.shape[0] == 1

    tb_eff = _choose_tile(batch, tb)
    num_tiles = _cdiv(batch, tb_eff)           # partial last tile handled by masking

    # SMEM is a 32-bit scalar space: keep params in f32 regardless of x dtype.
    w_flat = w.reshape(-1).astype(jnp.float32)  # (2,)
    b_flat = b.reshape(-1).astype(jnp.float32)  # (1,)

    out = pl.pallas_call(
        linear_kernel,
        out_shape=jax.ShapeDtypeStruct((1, batch), xt.dtype),
        grid=(num_tiles,),
        in_specs=[
            pl.BlockSpec((2, tb_eff), lambda i: (0, i)),              # x^T tile
            pl.BlockSpec(memory_space=pltpu.MemorySpace.SMEM),        # w scalars
            pl.BlockSpec(memory_space=pltpu.MemorySpace.SMEM),        # b scalar
        ],
        out_specs=pl.BlockSpec((1, tb_eff), lambda i: (0, i)),
        compiler_params=pltpu.CompilerParams(
            dimension_semantics=("parallel",),
        ),
        cost_estimate=pl.CostEstimate(
            flops=4 * batch,
            transcendentals=0,
            bytes_accessed=12 * batch,          # 8 B/row read + 4 B/row write
        ),
    )(xt, w_flat, b_flat)

    # Lane-dense (1, B) slab -> (B, 1): contiguous reshape, no copy.
    return out.reshape(batch, 1)


def linear_forward(x, w, b, *, tb: int = 262144, min_kernel_batch: int = 8192,
                   force_kernel: bool = False):
    """x: (B, 2), w: (1, 2), b: (1,) -> (B, 1). Matches nn.Linear(2, 1) forward."""
    batch, in_features = x.shape
    assert in_features == 2

    # Small-B fast path: transpose + launch overhead exceeds the actual work.
    if batch < min_kernel_batch and not force_kernel:
        return x @ w.T + b[None, :]

    # TODO(synk): the x.T below is one extra HBM pass; callers that can produce
    # feature-major activations should call linear_forward_feature_major directly.
    xt = x.T                                    # (2, B)
    return linear_forward_feature_major(xt, w, b, tb=tb)


if __name__ == "__main__":
    key = jax.random.PRNGKey(0)
    kx1, kx2, kw, kb = jax.random.split(key, 4)

    # Deterministic parameter init (same shapes as nn.Linear(2, 1)).
    in_features, out_features = 2, 1
    bound = 1.0 / jnp.sqrt(in_features)
    w = jax.random.uniform(kw, (out_features, in_features),
                           minval=-bound, maxval=bound, dtype=jnp.float32)
    b = jax.random.uniform(kb, (out_features,),
                           minval=-bound, maxval=bound, dtype=jnp.float32)

    # 1) Small batch, forced through the Pallas kernel (single masked 128-lane tile).
    B1 = 8
    x1 = jax.random.normal(kx1, (B1, in_features), dtype=jnp.float32)
    y1 = linear_forward(x1, w, b, force_kernel=True)
    jax.block_until_ready(y1)
    ref1 = x1 @ w.T + b[None, :]
    assert y1.shape == (B1, 1)
    assert jnp.allclose(y1, ref1, atol=1e-5, rtol=1e-5)

    # 2) Non-128-multiple batch with a small tile: multi-step grid + partial last tile.
    B2 = 300
    x2 = jax.random.normal(kx2, (B2, in_features), dtype=jnp.float32)
    y2 = linear_forward(x2, w, b, tb=256, force_kernel=True)
    jax.block_until_ready(y2)
    ref2 = x2 @ w.T + b[None, :]
    assert y2.shape == (B2, 1)
    assert jnp.allclose(y2, ref2, atol=1e-5, rtol=1e-5)

    # 3) Default small-B fast path (pure XLA) for completeness.
    y3 = linear_forward(x1, w, b)
    jax.block_until_ready(y3)
    assert jnp.allclose(y3, ref1, atol=1e-5, rtol=1e-5)

    print("KERNEL_OK")
</pallas_src>

<mosaic_0001>
module attributes {stable_mosaic.version = 11 : i64} {
  func.func @linear_kernel(%arg0: i32, %arg1: memref<2x128xf32, #tpu.memory_space<vmem>>, %arg2: memref<2xf32, #tpu.memory_space<smem>>, %arg3: memref<1xf32, #tpu.memory_space<smem>>, %arg4: memref<1x128xf32, #tpu.memory_space<vmem>>) attributes {dimension_semantics = [#tpu.dimension_semantics<parallel>], iteration_bounds = array<i64: 1>, scalar_prefetch = 0 : i64, scratch_operands = 0 : i64, tpu.core_type = #tpu.core_type<tc>, window_params = [{transform_indices = @transform_0, window_bounds = array<i64: 2, 128>}, {transform_indices = @transform_1, window_bounds = array<i64: 2>}, {transform_indices = @transform_2, window_bounds = array<i64: 1>}, {transform_indices = @transform_3, window_bounds = array<i64: 1, 128>}]} {
    %c0 = arith.constant 0 : index
    %0 = memref.load %arg2[%c0] : memref<2xf32, #tpu.memory_space<smem>>
    %c1 = arith.constant 1 : index
    %1 = memref.load %arg2[%c1] : memref<2xf32, #tpu.memory_space<smem>>
    %c0_0 = arith.constant 0 : index
    %2 = memref.load %arg3[%c0_0] : memref<1xf32, #tpu.memory_space<smem>>
    %c0_1 = arith.constant 0 : index
    %c0_2 = arith.constant 0 : index
    %3 = vector.load %arg1[%c0_1, %c0_2] : memref<2x128xf32, #tpu.memory_space<vmem>>, vector<1x128xf32>
    %c1_3 = arith.constant 1 : index
    %c0_4 = arith.constant 0 : index
    %4 = vector.load %arg1[%c1_3, %c0_4] : memref<2x128xf32, #tpu.memory_space<vmem>>, vector<1x128xf32>
    %5 = vector.broadcast %0 : f32 to vector<1x128xf32>
    %6 = arith.mulf %3, %5 : vector<1x128xf32>
    %7 = vector.broadcast %1 : f32 to vector<1x128xf32>
    %8 = arith.mulf %4, %7 : vector<1x128xf32>
    %9 = arith.addf %6, %8 : vector<1x128xf32>
    %10 = vector.broadcast %2 : f32 to vector<1x128xf32>
    %11 = arith.addf %9, %10 : vector<1x128xf32>
    %c0_5 = arith.constant 0 : index
    %c0_6 = arith.constant 0 : index
    %12 = vector.load %arg4[%c0_5, %c0_6] : memref<1x128xf32, #tpu.memory_space<vmem>>, vector<1x128xf32>
    tpu.vector_store %arg4[%c0_5, %c0_6], %11 {strides = array<i32>} : memref<1x128xf32, #tpu.memory_space<vmem>>, vector<1x128xf32>,
    return
  }
  func.func @transform_0(%arg0: i32) -> (i32, i32) {
    %c0_i32 = arith.constant 0 : i32
    %c0_i32_0 = arith.constant 0 : i32
    return %c0_i32, %arg0 : i32, i32
  }
  func.func @transform_1(%arg0: i32) -> i32 {
    %c0_i32 = arith.constant 0 : i32
    %c0_i32_0 = arith.constant 0 : i32
    return %c0_i32 : i32
  }
  func.func @transform_2(%arg0: i32) -> i32 {
    %c0_i32 = arith.constant 0 : i32
    %c0_i32_0 = arith.constant 0 : i32
    return %c0_i32 : i32
  }
  func.func @transform_3(%arg0: i32) -> (i32, i32) {
    %c0_i32 = arith.constant 0 : i32
    %c0_i32_0 = arith.constant 0 : i32
    return %c0_i32, %arg0 : i32, i32
  }
}

</mosaic_0001>

<bundles_post_ra>
// kernel: tpu_custom_call.1
= control target key start
LH: loop header
LB: loop body
LE: loop exit
PB: predicated region body
PF: predicated region fallthrough
CT: control target
= control target key end

     0   :  { %9 = vsyncpa [#allocation5], 0  ;;  %s133_s0 = inlined_call_operand.vmem [shape: f32[2,8], index: 0, kind: input, shape index: {}]   ;;  %s134_s1 = inlined_call_operand.vmem [shape: f32[2], index: 1, kind: input, shape index: {}]   ;;  %s135_s2 = inlined_call_operand.<no memory space> [shape: f32[1], index: 2, kind: input, shape index: {}]   ;;  %s136_s3 = inlined_call_operand.hbm [shape: f32[1,8], index: 3, kind: output, shape index: {}]  }
   0x1   :  { %10 = vsyncpa [#allocation4], 0  ;;  %s19_s14 = sshll.u32 %s134_s1, 4  ;;  %s20_s14 = int_to_ptr.vmem [resolvable:$true] %s19_s14 }
   0x2   :  { %s60_s15 = scalar_lea.vmem %s20_s14, 16  ;;  %p65_p1 = scmp.lt.s32.totalorder %s20_s14, %s20_s14 }
   0x3   :  { %p61_p0 = scmp.ne.s32.totalorder %s20_s14, %s60_s15  ;;  %p66_p2 = scmp.lt.s32.totalorder %s60_s15, %s60_s15 }
   0x5   :  { %p67_p3 = por %p66_p2, %p65_p1 }
   0x7   :  { %p68_p4 = pnand %p67_p3, %p61_p0 }
   0x9   :  { %71 = shalt.err (!%p68_p4)
}
   0xa   :  { %s96_s16 = smov [#allocation3]  }
   0xb   :  { %22 = dma.vmem_to_smem %s20_s14, 16, %s96_s16, [#allocation5]  }
   0xc   :  { %92 = dma.done.wait [#allocation5], 16  }
   0xd   :  { %93 = vsyncadd [#allocation5], 4294967280 }
   0xe   :  { %28 = sfence }
   0xf   :  { %s29_s17 = sld [smem:[#allocation3]]  ;;  %v32_v0 = vld [vmem:[%s133_s0] sm:$0x1]  ;;  %v33_v1 = vld [vmem:[%s133_s0 + $0x1] sm:$0x1]  ;;  %v39_v6 = vstv %s135_s2  ;;  %s97_s24 = smov [#allocation6]  }
  0x10   :  { %s57_s18 = sld [smem:[#allocation3 + $0x1]]  ;;  %s48_s25 = sshll.u32 %s97_s24, 4  ;;  %s49_s25 = int_to_ptr.vmem [resolvable:$true] %s48_s25 }
  0x11   :  { %s72_s26 = scalar_lea.vmem %s49_s25, 16  ;;  %s76_s27 = scalar_lea.vmem %s49_s25, 32 }
  0x12   :  { %p73_p5 = scmp.ne.s32.totalorder %s49_s25, %s72_s26  ;;  %p77_p6 = scmp.lt.s32.totalorder %s49_s25, %s49_s25 }
  0x13   :  { %p78_p7 = scmp.lt.s32.totalorder %s76_s27, %s72_s26 }
  0x15   :  { %v34_v2 = vstv %s29_s17  ;;  %p79_p8 = por %p78_p7, %p77_p6 }
  0x16   :  { %v35_v3 = vmul.f32 %v34_v2, %v32_v0  ;;  %v36_v4 = vstv %s57_s18 }
  0x17   :  { %v37_v5 = vmul.f32 %v36_v4, %v33_v1  ;;  %p80_p9 = pnand %p79_p8, %p73_p5 }
  0x19   :  { %v38_v7 = vadd.f32 %v37_v5, %v35_v3 }
  0x1b   :  { %v40_v8 = vadd.f32 %v39_v6, %v38_v7 }
  0x1d   :  { %41 = vst [vmem:[#allocation6] sm:$0x1] %v40_v8 }
  0x1e   :  { %83 = shalt.err (!%p80_p9)
}
  0x1f   :  { %51 = dma.vmem_to_hbm [thread:$0]  %s49_s25, 16, %s136_s3, [#allocation4]  }
  0x20   :  { %94 = dma.done.wait [#allocation4], 16  }
  0x21   :  { %95 = vsyncadd [#allocation4], 4294967280 }
  0x22   :  { %55 = vsyncpa [#allocation4], 1 }
  0x23   :  { %56 = vsyncpa [#allocation5], 1 }

</bundles_post_ra>
